<compile_context>
chip_gen: v6e
topology: v6e:2x2x1
jax: 0.10.0
libtpu: 0.0.40
codegen_flags: <defaults>
</compile_context>

<pallas_src>
import functools

import jax
import jax.numpy as jnp
from jax.experimental import pallas as pl
from jax.experimental.pallas import tpu as pltpu


def charnn_kernel(num_layers, vocab_size, hid_dim, vocab_out, batch, seq_len,
                  x_ref, slab_ref, out_ref):
    V, H, L, B, T = vocab_size, hid_dim, num_layers, batch, seq_len
    LH = L * H
    V_out = vocab_out

    # ---- read the packed parameter slab once (off the critical path) ----
    slab = slab_ref[...]                                   # (V + 2*LH + 1, W)
    A = slab[:V, :LH]                                      # (V, LH)  addend matrix
    W_wave = slab[V:V + LH, :LH]                           # (LH, LH) wavefront matrix
    fc_w = slab[V + LH:V + 2 * LH, :V_out]                 # (LH, V_out) zero-padded head
    fc_b = slab[V + 2 * LH:V + 2 * LH + 1, :V_out]         # (1, V_out)

    # ---- one matmul outside the recurrence: gather + layer-0 ih + ALL biases
    # NOTE: out-of-range token ids give an all-zero one-hot row (drops the bias
    # too); reference jnp.take clamps / nn.Embedding errors — differs only for
    # invalid input.
    ids = x_ref[...]                                       # (T*B, 1) int32, time-major
    iota_v = jax.lax.broadcasted_iota(jnp.int32, (T * B, V), 1)
    onehot = (ids == iota_v).astype(jnp.float32)           # (T*B, V)
    addend = jax.lax.dot_general(
        onehot, A, (((1,), (0,)), ((), ())),
        preferred_element_type=jnp.float32)                # (T*B, LH)

    # ---- wavefront recurrence: T + L - 1 fully unrolled steps ----
    # State = [h0^(s), h1^(s-1), ..., h_{L-1}^(s-L+1)] packed along lanes.
    col = jax.lax.broadcasted_iota(jnp.int32, (1, LH), 1)

    # step 0: the initial hidden state is zero, so there is no matmul at all.
    state = jnp.tanh(addend[0:B, :])
    if L > 1:
        state = jnp.where(col < H, state, 0.0)             # layers > 0 start at 0

    for s in range(1, T + L - 1):
        if s < T:
            add_s = addend[s * B:(s + 1) * B, :]           # contiguous row pair
        else:
            # tail steps: block 0 is never consumed; blocks >= 1 carry the
            # exact fused biases (any row of A has them).
            add_s = A[0:1, :]
        pre = jax.lax.dot_general(
            state, W_wave, (((1,), (0,)), ((), ())),
            preferred_element_type=jnp.float32) + add_s
        state = jnp.tanh(pre)
        if s < L - 1:                                      # keep not-yet-started layers at 0
            state = jnp.where(col < (s + 1) * H, state, 0.0)

    # ---- fc head: consumes the full state (zero rows mask earlier layers) ----
    out_ref[...] = (jax.lax.dot_general(
        state, fc_w, (((1,), (0,)), ((), ())),
        preferred_element_type=jnp.float32) + fc_b)        # (B, V_out)


def pack_params(params, num_layers):
    """Fold/fuse/pack the raw parameters into ONE contiguous f32 slab."""
    V, _E = params["embed"].shape
    H = params["w_hh_0"].shape[0]
    V_out = params["fc_w"].shape[1]
    L = num_layers
    LH = L * H
    W = max(LH, V_out)

    # A: one-hot addend matrix. block0 = embed @ w_ih_0 + (b_ih0 + b_hh0);
    # block l>=1 = broadcast of the fused bias (one-hot rows sum to 1).
    e_proj = jnp.dot(params["embed"].astype(jnp.float32),
                     params["w_ih_0"].astype(jnp.float32),
                     preferred_element_type=jnp.float32)          # (V, H)
    blocks = [e_proj + (params["b_ih_0"] + params["b_hh_0"])]
    for l in range(1, L):
        bl = params[f"b_ih_{l}"] + params[f"b_hh_{l}"]
        blocks.append(jnp.broadcast_to(bl, (V, H)))
    A = jnp.concatenate(blocks, axis=1).astype(jnp.float32)       # (V, LH)

    # Block-structured wavefront recurrence matrix.
    W_wave = jnp.zeros((LH, LH), jnp.float32)
    W_wave = W_wave.at[0:H, 0:H].set(params["w_hh_0"])
    for l in range(1, L):
        W_wave = W_wave.at[(l - 1) * H:l * H, l * H:(l + 1) * H].set(
            params[f"w_ih_{l}"])
        W_wave = W_wave.at[l * H:(l + 1) * H, l * H:(l + 1) * H].set(
            params[f"w_hh_{l}"])

    # fc head padded to read the full (B, LH) state (zero rows for layers < L-1).
    fc_full = jnp.zeros((LH, V_out), jnp.float32)
    fc_full = fc_full.at[(L - 1) * H:, :].set(params["fc_w"])
    fc_blk = jnp.concatenate([fc_full, params["fc_b"].astype(jnp.float32)],
                             axis=0)                              # (LH+1, V_out)

    def pad_w(a):
        return a if a.shape[1] == W else jnp.pad(a, ((0, 0), (0, W - a.shape[1])))

    slab = jnp.concatenate([pad_w(A), pad_w(W_wave), pad_w(fc_blk)], axis=0)
    return slab, (V, H, V_out)


def charnn_forward(x, slab, *, num_layers, vocab_size, hid_dim, vocab_out):
    """x: (B, T) int32 token ids; returns (B, vocab_out) f32 logits (last step)."""
    B, T = x.shape
    # time-major (T*B, 1) ids: per-step addend rows become contiguous pairs.
    x_tm = jnp.transpose(x).reshape(T * B, 1)

    kernel = functools.partial(charnn_kernel, num_layers, vocab_size, hid_dim,
                               vocab_out, B, T)
    vmem = pl.BlockSpec(memory_space=pltpu.MemorySpace.VMEM)
    return pl.pallas_call(
        kernel,
        out_shape=jax.ShapeDtypeStruct((B, vocab_out), jnp.float32),
        in_specs=[vmem, vmem],
        out_specs=vmem,
    )(x_tm, slab)


def init_params(key, vocab_size, hid_dim, num_layers, embedding_dim):
    """Deterministic synthetic init mimicking PyTorch default shapes,
    pre-transposed to `act @ W` convention."""
    keys = iter(jax.random.split(key, 4 * num_layers + 4))
    bound = 1.0 / jnp.sqrt(hid_dim)
    params = {}
    params["embed"] = jax.random.normal(next(keys), (vocab_size, embedding_dim),
                                        jnp.float32)
    for l in range(num_layers):
        in_dim = embedding_dim if l == 0 else hid_dim
        params[f"w_ih_{l}"] = jax.random.uniform(
            next(keys), (in_dim, hid_dim), jnp.float32, -bound, bound)
        params[f"w_hh_{l}"] = jax.random.uniform(
            next(keys), (hid_dim, hid_dim), jnp.float32, -bound, bound)
        params[f"b_ih_{l}"] = jax.random.uniform(
            next(keys), (1, hid_dim), jnp.float32, -bound, bound)
        params[f"b_hh_{l}"] = jax.random.uniform(
            next(keys), (1, hid_dim), jnp.float32, -bound, bound)
    fc_bound = 1.0 / jnp.sqrt(hid_dim)
    params["fc_w"] = jax.random.uniform(
        next(keys), (hid_dim, vocab_size), jnp.float32, -fc_bound, fc_bound)
    params["fc_b"] = jax.random.uniform(
        next(keys), (1, vocab_size), jnp.float32, -fc_bound, fc_bound)
    return params


def charnn_reference(x, params, *, num_layers):
    """Pure-JAX reference of the PyTorch forward, for correctness checks."""
    embedded = jnp.take(params["embed"], x, axis=0)            # (B, T, E)
    B, T, _ = embedded.shape
    H = params["w_hh_0"].shape[0]
    h = [jnp.zeros((B, H), jnp.float32) for _ in range(num_layers)]
    for t in range(T):
        inp = embedded[:, t, :]
        for l in range(num_layers):
            pre = (inp @ params[f"w_ih_{l}"] + h[l] @ params[f"w_hh_{l}"]
                   + params[f"b_ih_{l}"] + params[f"b_hh_{l}"])
            h[l] = jnp.tanh(pre)
            inp = h[l]
    return h[-1] @ params["fc_w"] + params["fc_b"]             # (B, V)


if __name__ == "__main__":
    VOCAB, HID, LAYERS, EMBED = 32, 32, 2, 16
    B, T = 2, 8

    key = jax.random.PRNGKey(0)
    k_x, k_p = jax.random.split(key)
    x = jax.random.randint(k_x, (B, T), 0, VOCAB, dtype=jnp.int32)
    params = init_params(k_p, VOCAB, HID, LAYERS, EMBED)

    # Pack once (out of the per-call hot path), jit the forward.
    slab, (V, H, V_out) = pack_params(params, LAYERS)
    slab = jax.block_until_ready(slab)
    fwd = jax.jit(functools.partial(charnn_forward, num_layers=LAYERS,
                                    vocab_size=V, hid_dim=H, vocab_out=V_out))

    out = jax.block_until_ready(fwd(x, slab))

    ref = charnn_reference(x, params, num_layers=LAYERS)
    assert out.shape == (B, VOCAB)
    assert jnp.allclose(out, ref, atol=1e-4, rtol=1e-4), (
        f"max abs diff {jnp.max(jnp.abs(out - ref))}")

    print("KERNEL_OK")
</pallas_src>

<mosaic_0001>
module attributes {stable_mosaic.version = 11 : i64} {
  func.func @charnn_kernel(%arg0: memref<16x1xi32, #tpu.memory_space<vmem>>, %arg1: memref<161x64xf32, #tpu.memory_space<vmem>>, %arg2: memref<2x32xf32, #tpu.memory_space<vmem>>) attributes {dimension_semantics = [], scalar_prefetch = 0 : i64, scratch_operands = 0 : i64, tpu.core_type = #tpu.core_type<tc>} {
    %c0 = arith.constant 0 : index
    %c0_0 = arith.constant 0 : index
    %0 = vector.load %arg1[%c0, %c0_0] : memref<161x64xf32, #tpu.memory_space<vmem>>, vector<161x64xf32>
    %1 = vector.extract_strided_slice %0 {offsets = [0, 0], sizes = [32, 64], strides = [1, 1]} : vector<161x64xf32> to vector<32x64xf32>
    %2 = vector.extract_strided_slice %0 {offsets = [32, 0], sizes = [64, 64], strides = [1, 1]} : vector<161x64xf32> to vector<64x64xf32>
    %3 = vector.extract_strided_slice %0 {offsets = [96, 0], sizes = [64, 32], strides = [1, 1]} : vector<161x64xf32> to vector<64x32xf32>
    %4 = vector.extract_strided_slice %0 {offsets = [160, 0], sizes = [1, 32], strides = [1, 1]} : vector<161x64xf32> to vector<1x32xf32>
    %c0_1 = arith.constant 0 : index
    %c0_2 = arith.constant 0 : index
    %5 = vector.load %arg0[%c0_1, %c0_2] : memref<16x1xi32, #tpu.memory_space<vmem>>, vector<16x1xi32>
    %6 = tpu.iota {dimensions = array<i32: 1>} : vector<16x32xi32>
    %7 = vector.broadcast %5 : vector<16x1xi32> to vector<16x32xi32>
    %8 = arith.cmpi eq, %7, %6 : vector<16x32xi32>
    %9 = arith.extui %8 : vector<16x32xi1> to vector<16x32xi32>
    %10 = arith.sitofp %9 : vector<16x32xi32> to vector<16x32xf32>
    %cst = arith.constant dense<0.000000e+00> : vector<16x64xf32>
    %11 = tpu.matmul %10, %1, %cst {dimension_numbers = #tpu.dot_dimension_numbers<[1], [0], [0], [1], [0, 0, 1, 1], [], []>} : vector<16x32xf32>, vector<32x64xf32>, vector<16x64xf32> -> vector<16x64xf32>
    %12 = tpu.iota {dimensions = array<i32: 1>} : vector<1x64xi32>
    %13 = vector.extract_strided_slice %11 {offsets = [0, 0], sizes = [2, 64], strides = [1, 1]} : vector<16x64xf32> to vector<2x64xf32>
    %14 = math.tanh %13 : vector<2x64xf32>
    %c32_i32 = arith.constant 32 : i32
    %15 = vector.broadcast %c32_i32 : i32 to vector<1x64xi32>
    %16 = arith.cmpi slt, %12, %15 : vector<1x64xi32>
    %cst_3 = arith.constant 0.000000e+00 : f32
    %17 = vector.shape_cast %16 : vector<1x64xi1> to vector<1x64xi1>
    %18 = vector.broadcast %17 : vector<1x64xi1> to vector<2x64xi1>
    %19 = vector.broadcast %cst_3 : f32 to vector<2x64xf32>
    %20 = arith.select %18, %14, %19 : vector<2x64xi1>, vector<2x64xf32>
    %21 = vector.extract_strided_slice %11 {offsets = [2, 0], sizes = [2, 64], strides = [1, 1]} : vector<16x64xf32> to vector<2x64xf32>
    %cst_4 = arith.constant dense<0.000000e+00> : vector<2x64xf32>
    %22 = tpu.matmul %20, %2, %cst_4 {dimension_numbers = #tpu.dot_dimension_numbers<[1], [0], [0], [1], [0, 0, 1, 1], [], []>} : vector<2x64xf32>, vector<64x64xf32>, vector<2x64xf32> -> vector<2x64xf32>
    %23 = arith.addf %22, %21 : vector<2x64xf32>
    %24 = math.tanh %23 : vector<2x64xf32>
    %25 = vector.extract_strided_slice %11 {offsets = [4, 0], sizes = [2, 64], strides = [1, 1]} : vector<16x64xf32> to vector<2x64xf32>
    %cst_5 = arith.constant dense<0.000000e+00> : vector<2x64xf32>
    %26 = tpu.matmul %24, %2, %cst_5 {dimension_numbers = #tpu.dot_dimension_numbers<[1], [0], [0], [1], [0, 0, 1, 1], [], []>} : vector<2x64xf32>, vector<64x64xf32>, vector<2x64xf32> -> vector<2x64xf32>
    %27 = arith.addf %26, %25 : vector<2x64xf32>
    %28 = math.tanh %27 : vector<2x64xf32>
    %29 = vector.extract_strided_slice %11 {offsets = [6, 0], sizes = [2, 64], strides = [1, 1]} : vector<16x64xf32> to vector<2x64xf32>
    %cst_6 = arith.constant dense<0.000000e+00> : vector<2x64xf32>
    %30 = tpu.matmul %28, %2, %cst_6 {dimension_numbers = #tpu.dot_dimension_numbers<[1], [0], [0], [1], [0, 0, 1, 1], [], []>} : vector<2x64xf32>, vector<64x64xf32>, vector<2x64xf32> -> vector<2x64xf32>
    %31 = arith.addf %30, %29 : vector<2x64xf32>
    %32 = math.tanh %31 : vector<2x64xf32>
    %33 = vector.extract_strided_slice %11 {offsets = [8, 0], sizes = [2, 64], strides = [1, 1]} : vector<16x64xf32> to vector<2x64xf32>
    %cst_7 = arith.constant dense<0.000000e+00> : vector<2x64xf32>
    %34 = tpu.matmul %32, %2, %cst_7 {dimension_numbers = #tpu.dot_dimension_numbers<[1], [0], [0], [1], [0, 0, 1, 1], [], []>} : vector<2x64xf32>, vector<64x64xf32>, vector<2x64xf32> -> vector<2x64xf32>
    %35 = arith.addf %34, %33 : vector<2x64xf32>
    %36 = math.tanh %35 : vector<2x64xf32>
    %37 = vector.extract_strided_slice %11 {offsets = [10, 0], sizes = [2, 64], strides = [1, 1]} : vector<16x64xf32> to vector<2x64xf32>
    %cst_8 = arith.constant dense<0.000000e+00> : vector<2x64xf32>
    %38 = tpu.matmul %36, %2, %cst_8 {dimension_numbers = #tpu.dot_dimension_numbers<[1], [0], [0], [1], [0, 0, 1, 1], [], []>} : vector<2x64xf32>, vector<64x64xf32>, vector<2x64xf32> -> vector<2x64xf32>
    %39 = arith.addf %38, %37 : vector<2x64xf32>
    %40 = math.tanh %39 : vector<2x64xf32>
    %41 = vector.extract_strided_slice %11 {offsets = [12, 0], sizes = [2, 64], strides = [1, 1]} : vector<16x64xf32> to vector<2x64xf32>
    %cst_9 = arith.constant dense<0.000000e+00> : vector<2x64xf32>
    %42 = tpu.matmul %40, %2, %cst_9 {dimension_numbers = #tpu.dot_dimension_numbers<[1], [0], [0], [1], [0, 0, 1, 1], [], []>} : vector<2x64xf32>, vector<64x64xf32>, vector<2x64xf32> -> vector<2x64xf32>
    %43 = arith.addf %42, %41 : vector<2x64xf32>
    %44 = math.tanh %43 : vector<2x64xf32>
    %45 = vector.extract_strided_slice %11 {offsets = [14, 0], sizes = [2, 64], strides = [1, 1]} : vector<16x64xf32> to vector<2x64xf32>
    %cst_10 = arith.constant dense<0.000000e+00> : vector<2x64xf32>
    %46 = tpu.matmul %44, %2, %cst_10 {dimension_numbers = #tpu.dot_dimension_numbers<[1], [0], [0], [1], [0, 0, 1, 1], [], []>} : vector<2x64xf32>, vector<64x64xf32>, vector<2x64xf32> -> vector<2x64xf32>
    %47 = arith.addf %46, %45 : vector<2x64xf32>
    %48 = math.tanh %47 : vector<2x64xf32>
    %49 = vector.extract_strided_slice %1 {offsets = [0, 0], sizes = [1, 64], strides = [1, 1]} : vector<32x64xf32> to vector<1x64xf32>
    %cst_11 = arith.constant dense<0.000000e+00> : vector<2x64xf32>
    %50 = tpu.matmul %48, %2, %cst_11 {dimension_numbers = #tpu.dot_dimension_numbers<[1], [0], [0], [1], [0, 0, 1, 1], [], []>} : vector<2x64xf32>, vector<64x64xf32>, vector<2x64xf32> -> vector<2x64xf32>
    %51 = vector.broadcast %49 : vector<1x64xf32> to vector<2x64xf32>
    %52 = arith.addf %50, %51 : vector<2x64xf32>
    %53 = math.tanh %52 : vector<2x64xf32>
    %cst_12 = arith.constant dense<0.000000e+00> : vector<2x32xf32>
    %54 = tpu.matmul %53, %3, %cst_12 {dimension_numbers = #tpu.dot_dimension_numbers<[1], [0], [0], [1], [0, 0, 1, 1], [], []>} : vector<2x64xf32>, vector<64x32xf32>, vector<2x32xf32> -> vector<2x32xf32>
    %55 = vector.broadcast %4 : vector<1x32xf32> to vector<2x32xf32>
    %56 = arith.addf %54, %55 : vector<2x32xf32>
    %c0_13 = arith.constant 0 : index
    %c0_14 = arith.constant 0 : index
    %57 = vector.load %arg2[%c0_13, %c0_14] : memref<2x32xf32, #tpu.memory_space<vmem>>, vector<2x32xf32>
    tpu.vector_store %arg2[%c0_13, %c0_14], %56 {strides = array<i32>} : memref<2x32xf32, #tpu.memory_space<vmem>>, vector<2x32xf32>,
    return
  }
}

</mosaic_0001>

<bundles_post_ra>
// kernel: charnn_forward.1
= control target key start
LH: loop header
LB: loop body
LE: loop exit
PB: predicated region body
PF: predicated region fallthrough
CT: control target
= control target key end

     0   :  { %v1168_v2 = vmov 0   ;;  %s1459_s0 = inlined_call_operand.vmem [shape: s32[16,1], index: 0, kind: input, shape index: {}]   ;;  %s1460_s1 = inlined_call_operand.vmem [shape: f32[161,64], index: 1, kind: input, shape index: {}]   ;;  %s1461_s2 = inlined_call_operand.hbm [shape: f32[2,32], index: 2, kind: output, shape index: {}]  }
   0x1   :  { %v33_v0 = vld [vmem:[%s1459_s0] sm:$0xff]  ;;  %v15_v1 = vld [vmem:[%s1460_s1 + $0x18] sm:$0xff]  ;;  %1127 = vset.pattern.permute.xlu0 %v1168_v2  ;;  %v14_v3 = vld [vmem:[%s1460_s1 + $0x10] sm:$0xff] }
   0x2   :  { %941 = vmatprep.subr.mxu0 %v15_v1  ;;  %38 = vperm.xlu0 %1127, %v33_v0   ;;  %v13_v4 = vld [vmem:[%s1460_s1 + $0x8] sm:$0xff] }
   0x3   :  { %942 = vmatpush3.msra.mxu0 %v15_v1 }
   0x4   :  { %7 = vsyncpa [#allocation3], 0  ;;  %v34_v5 = vld [vmem:[%s1459_s0 + $0x8] sm:$0xff]  ;;  %943 = vmatprep.subr.mxu0 %v14_v3  ;;  %v1169_v6 = vmov 0.0   ;;  %v1206_v7 = vld [vmem:[%s1460_s1] sm:$0xff]  ;;  %v35_v8 = vlaneseq  ;;  %vm49_vm0 = vcmask 261120  }
   0x5   :  { %952 = vmatprep.subr.mxu1 %v1169_v6  ;;  %944 = vmatpush3.msra.mxu0 %v14_v3  ;;  %v1217_v14 = vld [vmem:[%s1460_s1 + $0x58] sm:$0xff]  ;;  %v1223_v15 = vld [vmem:[%s1460_s1 + $0x50] sm:$0xff]  ;;  %v1230_v16 = vld [vmem:[%s1460_s1 + $0x48] sm:$0xff]  ;;  %vm1170_vm3 = vmmov 0   ;;  %vm139_vm5 = vcmask 523264   ;;  %s1171_s25 = smov [#allocation2]  }
   0x6   :  { %945 = vmatprep.subr.mxu0 %v13_v4  ;;  %41 = vperm.xlu0 %1127, %v34_v5   ;;  %v36_v9 = vand.u32 127, %v35_v8  ;;  %v1240_v17 = vld [vmem:[%s1460_s1 + $0x40] sm:$0xff]  ;;  %v1249_v18 = vld [vmem:[%s1460_s1 + $0x38] sm:$0xff]  ;;  %v1258_v19 = vld [vmem:[%s1460_s1 + $0x30] sm:$0xff]  ;;  %s832_s26 = sshll.u32 %s1171_s25, 4  ;;  %vm824_vm6 = vcmask 254976   ;;  %s833_s26 = int_to_ptr.vmem [resolvable:$true] %s832_s26 }
   0x7   :  { %946 = vmatpush3.msra.mxu0 %v13_v4  ;;  %953 = vmatpush3.msra.mxu1 %v1217_v14  ;;  %v1267_v20 = vld [vmem:[%s1460_s1 + $0x28] sm:$0xff]  ;;  %v1276_v21 = vld [vmem:[%s1460_s1 + $0x20] sm:$0xff]  ;;  %v31_v60 = vld [vmem:[%s1460_s1 + $0x98] sm:$0xff]  ;;  %v670_v4 = vshrl.u32 %v35_v8, 7  ;;  %s1146_s27 = scalar_lea.vmem %s833_s26, 32  ;;  %p1151_p1 = scmp.lt.s32.totalorder %s833_s26, %s833_s26 }
   0x8   :  { %947 = vmatprep.subr.mxu0 %v1206_v7  ;;  %954 = vmatprep.subr.mxu1 %v1169_v6  ;;  %vm132_vm4 = vcmp.lt.s32.totalorder %v36_v9, 32  ;;  %v30_v61 = vld [vmem:[%s1460_s1 + $0x90] sm:$0xff]  ;;  %v29_v62 = vld [vmem:[%s1460_s1 + $0x88] sm:$0xff]  ;;  %v28_v63 = vld [vmem:[%s1460_s1 + $0x80] sm:$0xff]  ;;  %p1147_p0 = scmp.ne.s32.totalorder %s833_s26, %s1146_s27  ;;  %p1152_p2 = scmp.lt.s32.totalorder %s1146_s27, %s1146_s27 }
   0x9   :  { %948 = vmatpush3.msra.mxu0 %v1206_v7  ;;  %968 = vmatprep.mubr.msk.f32.mxu1 %vm1170_vm3, %v1169_v6  ;;  %v27_v0 = vld [vmem:[%s1460_s1 + $0x78] sm:$0xff]  ;;  %v26_v1 = vld [vmem:[%s1460_s1 + $0x70] sm:$0xff]  ;;  %v25_v2 = vld [vmem:[%s1460_s1 + $0x68] sm:$0xff]  ;;  %v671_v5 = vsub.s32 0, %v670_v4 }
   0xa   :  { %971 = vmatprep.subr.mxu0 %v1169_v6  ;;  %955 = vmatpush3.msra.mxu1 %v1223_v15  ;;  %v24_v3 = vld [vmem:[%s1460_s1 + $0x60] sm:$0xff]  ;;  %p1153_p3 = por %p1152_p2, %p1151_p1 }
   0xb   :  { %956 = vmatprep.subr.mxu1 %v1169_v6 }
   0xc   :  { %957 = vmatpush3.msra.mxu1 %v1230_v16  ;;  %p1154_p4 = pnand %p1153_p3, %p1147_p0 }
   0xd   :  { %958 = vmatprep.subr.mxu1 %v1169_v6 }
   0xe   :  { %959 = vmatpush3.msra.mxu1 %v1240_v17 }
   0xf   :  { %960 = vmatprep.subr.mxu1 %v1169_v6 }
  0x10   :  { %961 = vmatpush3.msra.mxu1 %v1249_v18 }
  0x11   :  { %962 = vmatprep.subr.mxu1 %v1169_v6 }
  0x12   :  { %963 = vmatpush3.msra.mxu1 %v1258_v19 }
  0x13   :  { %964 = vmatprep.subr.mxu1 %v1169_v6 }
  0x14   :  { %965 = vmatpush3.msra.mxu1 %v1267_v20 }
  0x15   :  { %966 = vmatprep.subr.mxu1 %v1169_v6 }
  0x16   :  { %967 = vmatpush3.msra.mxu1 %v1276_v21 }
  0x17   :  { %990 = vmatprep.subr.mxu1 %v1169_v6 }
  0x7d   :  { %v39_v10 = vpop.permute.xlu0 %38 }
  0x7e   :  { %vm43_vm1 = vcmp.eq.s32.totalorder %v39_v10, %v36_v9 }
  0x7f   :  { %v840_v11 = vsel %vm43_vm1, 1.0, %v1169_v6 }
  0x80   :  { %949 = vmatprep.mubr.msk.f32.mxu0 %vm49_vm0, %v840_v11 }
  0x81   :  { %v42_v12 = vpop.permute.xlu0 %41 }
  0x82   :  { %vm44_vm2 = vcmp.eq.s32.totalorder %v42_v12, %v36_v9  ;;  %v672_v9 = vrot.slane %v1206_v7, %v671_v5 }
  0x83   :  { %v841_v13 = vsel %vm44_vm2, 1.0, %v1169_v6 }
  0x84   :  { %950 = vmatmul.mubr.msk.f32.vlgmr.msra.gmra.mxu0 %vm49_vm0, %v841_v13 }
  0x85   :  { %972 = vmatpush3.msra.mxu0 %v1217_v14  ;;  %987 = vmatprep.mubr.msk.f32.mxu0 %vm1170_vm3, %v1169_v6 }
  0x86   :  { %973 = vmatprep.subr.mxu0 %v1169_v6 }
  0x87   :  { %974 = vmatpush3.msra.mxu0 %v1223_v15 }
  0x88   :  { %975 = vmatprep.subr.mxu0 %v1169_v6 }
  0x89   :  { %976 = vmatpush3.msra.mxu0 %v1230_v16 }
  0x8a   :  { %977 = vmatprep.subr.mxu0 %v1169_v6 }
  0x8b   :  { %978 = vmatpush3.msra.mxu0 %v1240_v17 }
  0x8c   :  { %979 = vmatprep.subr.mxu0 %v1169_v6 }
  0x8d   :  { %980 = vmatpush3.msra.mxu0 %v1249_v18 }
  0x8e   :  { %981 = vmatprep.subr.mxu0 %v1169_v6 }
  0x8f   :  { %982 = vmatpush3.msra.mxu0 %v1258_v19 }
  0x90   :  { %983 = vmatprep.subr.mxu0 %v1169_v6 }
  0x91   :  { %984 = vmatpush3.msra.mxu0 %v1267_v20 }
  0x92   :  { %985 = vmatprep.subr.mxu0 %v1169_v6 }
  0x93   :  { %986 = vmatpush3.msra.mxu0 %v1276_v21 }
  0x94   :  { %1009 = vmatprep.subr.mxu0 %v1169_v6 }
 0x144   :  { %v1290_v22 = vpop.f32.mrf.mxu0 }
 0x145   :  { %v441_v45 = vrot.slane %v1290_v22, 2  ;;  %v517_v50 = vrot.slane %v1290_v22, 4  ;;  %v593_v55 = vrot.slane %v1290_v22, 6 }
 0x146   :  { %v1292_v23 = vpop.f32.mrf.mxu0 }
 0x147   :  { %1128 = vtanh.f32 %v1292_v23  ;;  %v137_v26 = vrot.slane %v1292_v23, 2  ;;  %v214_v31 = vrot.slane %v1292_v23, 4  ;;  %v290_v36 = vrot.slane %v1292_v23, 6 }
 0x154   :  { %v1129_v24 = vpop.eup %1128 }
 0x155   :  { %v135_v25 = vsel %vm132_vm4, %v1129_v24, 0.0 }
 0x156   :  { %969 = vmatmul.mubr.msk.f32.vlgmr.msra.gmra.mxu1 %vm139_vm5, %v135_v25 }
 0x157   :  { %991 = vmatpush3.msra.mxu1 %v1217_v14  ;;  %1006 = vmatprep.mubr.msk.f32.mxu1 %vm1170_vm3, %v1169_v6 }
 0x158   :  { %992 = vmatprep.subr.mxu1 %v1169_v6 }
 0x159   :  { %993 = vmatpush3.msra.mxu1 %v1223_v15 }
 0x15a   :  { %994 = vmatprep.subr.mxu1 %v1169_v6 }
 0x15b   :  { %995 = vmatpush3.msra.mxu1 %v1230_v16 }
 0x15c   :  { %996 = vmatprep.subr.mxu1 %v1169_v6 }
 0x15d   :  { %997 = vmatpush3.msra.mxu1 %v1240_v17 }
 0x15e   :  { %998 = vmatprep.subr.mxu1 %v1169_v6 }
 0x15f   :  { %999 = vmatpush3.msra.mxu1 %v1249_v18 }
 0x160   :  { %1000 = vmatprep.subr.mxu1 %v1169_v6 }
 0x161   :  { %1001 = vmatpush3.msra.mxu1 %v1258_v19 }
 0x162   :  { %1002 = vmatprep.subr.mxu1 %v1169_v6 }
 0x163   :  { %1003 = vmatpush3.msra.mxu1 %v1267_v20 }
 0x164   :  { %1004 = vmatprep.subr.mxu1 %v1169_v6 }
 0x165   :  { %1005 = vmatpush3.msra.mxu1 %v1276_v21 }
 0x166   :  { %1028 = vmatprep.subr.mxu1 %v1169_v6 }
 0x216   :  { %v209_v27 = vpop.f32.mrf.mxu1 }
 0x217   :  { %v210_v28 = vadd.f32 %v209_v27, %v137_v26 }
 0x218   :  { %v970_v29 = vpop.f32.mrf.mxu1 }
 0x219   :  { %1130 = vtanh.f32 %v210_v28 }
 0x226   :  { %v1131_v30 = vpop.eup %1130 }
 0x227   :  { %988 = vmatmul.mubr.msk.f32.vlgmr.msra.gmra.mxu0 %vm139_vm5, %v1131_v30 }
 0x228   :  { %1010 = vmatpush3.msra.mxu0 %v1217_v14  ;;  %1025 = vmatprep.mubr.msk.f32.mxu0 %vm1170_vm3, %v1169_v6 }
 0x229   :  { %1011 = vmatprep.subr.mxu0 %v1169_v6 }
 0x22a   :  { %1012 = vmatpush3.msra.mxu0 %v1223_v15 }
 0x22b   :  { %1013 = vmatprep.subr.mxu0 %v1169_v6 }
 0x22c   :  { %1014 = vmatpush3.msra.mxu0 %v1230_v16 }
 0x22d   :  { %1015 = vmatprep.subr.mxu0 %v1169_v6 }
 0x22e   :  { %1016 = vmatpush3.msra.mxu0 %v1240_v17 }
 0x22f   :  { %1017 = vmatprep.subr.mxu0 %v1169_v6 }
 0x230   :  { %1018 = vmatpush3.msra.mxu0 %v1249_v18 }
 0x231   :  { %1019 = vmatprep.subr.mxu0 %v1169_v6 }
 0x232   :  { %1020 = vmatpush3.msra.mxu0 %v1258_v19 }
 0x233   :  { %1021 = vmatprep.subr.mxu0 %v1169_v6 }
 0x234   :  { %1022 = vmatpush3.msra.mxu0 %v1267_v20 }
 0x235   :  { %1023 = vmatprep.subr.mxu0 %v1169_v6 }
 0x236   :  { %1024 = vmatpush3.msra.mxu0 %v1276_v21 }
 0x237   :  { %1047 = vmatprep.subr.mxu0 %v1169_v6 }
 0x2e7   :  { %v285_v32 = vpop.f32.mrf.mxu0 }
 0x2e8   :  { %v286_v33 = vadd.f32 %v285_v32, %v214_v31 }
 0x2e9   :  { %v989_v34 = vpop.f32.mrf.mxu0 }
 0x2ea   :  { %1132 = vtanh.f32 %v286_v33 }
 0x2f7   :  { %v1133_v35 = vpop.eup %1132 }
 0x2f8   :  { %1007 = vmatmul.mubr.msk.f32.vlgmr.msra.gmra.mxu1 %vm139_vm5, %v1133_v35 }
 0x2f9   :  { %1029 = vmatpush3.msra.mxu1 %v1217_v14  ;;  %1044 = vmatprep.mubr.msk.f32.mxu1 %vm1170_vm3, %v1169_v6 }
 0x2fa   :  { %1030 = vmatprep.subr.mxu1 %v1169_v6 }
 0x2fb   :  { %1031 = vmatpush3.msra.mxu1 %v1223_v15 }
 0x2fc   :  { %1032 = vmatprep.subr.mxu1 %v1169_v6 }
 0x2fd   :  { %1033 = vmatpush3.msra.mxu1 %v1230_v16 }
 0x2fe   :  { %1034 = vmatprep.subr.mxu1 %v1169_v6 }
 0x2ff   :  { %1035 = vmatpush3.msra.mxu1 %v1240_v17 }
 0x300   :  { %1036 = vmatprep.subr.mxu1 %v1169_v6 }
 0x301   :  { %1037 = vmatpush3.msra.mxu1 %v1249_v18 }
 0x302   :  { %1038 = vmatprep.subr.mxu1 %v1169_v6 }
 0x303   :  { %1039 = vmatpush3.msra.mxu1 %v1258_v19 }
 0x304   :  { %1040 = vmatprep.subr.mxu1 %v1169_v6 }
 0x305   :  { %1041 = vmatpush3.msra.mxu1 %v1267_v20 }
 0x306   :  { %1042 = vmatprep.subr.mxu1 %v1169_v6 }
 0x307   :  { %1043 = vmatpush3.msra.mxu1 %v1276_v21 }
 0x308   :  { %1066 = vmatprep.subr.mxu1 %v1169_v6 }
 0x3b8   :  { %v361_v37 = vpop.f32.mrf.mxu1 }
 0x3b9   :  { %v362_v38 = vadd.f32 %v361_v37, %v290_v36 }
 0x3ba   :  { %v1008_v39 = vpop.f32.mrf.mxu1 }
 0x3bb   :  { %1134 = vtanh.f32 %v362_v38 }
 0x3c8   :  { %v1135_v40 = vpop.eup %1134 }
 0x3c9   :  { %1026 = vmatmul.mubr.msk.f32.vlgmr.msra.gmra.mxu0 %vm139_vm5, %v1135_v40 }
 0x3ca   :  { %1048 = vmatpush3.msra.mxu0 %v1217_v14  ;;  %1063 = vmatprep.mubr.msk.f32.mxu0 %vm1170_vm3, %v1169_v6 }
 0x3cb   :  { %1049 = vmatprep.subr.mxu0 %v1169_v6 }
 0x3cc   :  { %1050 = vmatpush3.msra.mxu0 %v1223_v15 }
 0x3cd   :  { %1051 = vmatprep.subr.mxu0 %v1169_v6 }
 0x3ce   :  { %1052 = vmatpush3.msra.mxu0 %v1230_v16 }
 0x3cf   :  { %1053 = vmatprep.subr.mxu0 %v1169_v6 }
 0x3d0   :  { %1054 = vmatpush3.msra.mxu0 %v1240_v17 }
 0x3d1   :  { %1055 = vmatprep.subr.mxu0 %v1169_v6 }
 0x3d2   :  { %1056 = vmatpush3.msra.mxu0 %v1249_v18 }
 0x3d3   :  { %1057 = vmatprep.subr.mxu0 %v1169_v6 }
 0x3d4   :  { %1058 = vmatpush3.msra.mxu0 %v1258_v19 }
 0x3d5   :  { %1059 = vmatprep.subr.mxu0 %v1169_v6 }
 0x3d6   :  { %1060 = vmatpush3.msra.mxu0 %v1267_v20 }
 0x3d7   :  { %1061 = vmatprep.subr.mxu0 %v1169_v6 }
 0x3d8   :  { %1062 = vmatpush3.msra.mxu0 %v1276_v21 }
 0x3d9   :  { %1085 = vmatprep.subr.mxu0 %v1169_v6 }
 0x489   :  { %v435_v41 = vpop.f32.mrf.mxu0 }
 0x48a   :  { %v436_v42 = vadd.f32 %v1290_v22, %v435_v41 }
 0x48b   :  { %v1027_v43 = vpop.f32.mrf.mxu0 }
 0x48c   :  { %1136 = vtanh.f32 %v436_v42 }
 0x499   :  { %v1137_v44 = vpop.eup %1136 }
 0x49a   :  { %1045 = vmatmul.mubr.msk.f32.vlgmr.msra.gmra.mxu1 %vm139_vm5, %v1137_v44 }
 0x49b   :  { %1067 = vmatpush3.msra.mxu1 %v1217_v14  ;;  %1082 = vmatprep.mubr.msk.f32.mxu1 %vm1170_vm3, %v1169_v6 }
 0x49c   :  { %1068 = vmatprep.subr.mxu1 %v1169_v6 }
 0x49d   :  { %1069 = vmatpush3.msra.mxu1 %v1223_v15 }
 0x49e   :  { %1070 = vmatprep.subr.mxu1 %v1169_v6 }
 0x49f   :  { %1071 = vmatpush3.msra.mxu1 %v1230_v16 }
 0x4a0   :  { %1072 = vmatprep.subr.mxu1 %v1169_v6 }
 0x4a1   :  { %1073 = vmatpush3.msra.mxu1 %v1240_v17 }
 0x4a2   :  { %1074 = vmatprep.subr.mxu1 %v1169_v6 }
 0x4a3   :  { %1075 = vmatpush3.msra.mxu1 %v1249_v18 }
 0x4a4   :  { %1076 = vmatprep.subr.mxu1 %v1169_v6 }
 0x4a5   :  { %1077 = vmatpush3.msra.mxu1 %v1258_v19 }
 0x4a6   :  { %1078 = vmatprep.subr.mxu1 %v1169_v6 }
 0x4a7   :  { %1079 = vmatpush3.msra.mxu1 %v1267_v20 }
 0x4a8   :  { %1080 = vmatprep.subr.mxu1 %v1169_v6 }
 0x4a9   :  { %1081 = vmatpush3.msra.mxu1 %v1276_v21 }
 0x4aa   :  { %1104 = vmatprep.subr.mxu1 %v1169_v6 }
 0x55a   :  { %v512_v46 = vpop.f32.mrf.mxu1 }
 0x55b   :  { %v513_v47 = vadd.f32 %v512_v46, %v441_v45 }
 0x55c   :  { %v1046_v48 = vpop.f32.mrf.mxu1 }
 0x55d   :  { %1138 = vtanh.f32 %v513_v47 }
 0x56a   :  { %v1139_v49 = vpop.eup %1138 }
 0x56b   :  { %1064 = vmatmul.mubr.msk.f32.vlgmr.msra.gmra.mxu0 %vm139_vm5, %v1139_v49 }
 0x56c   :  { %1086 = vmatpush3.msra.mxu0 %v1217_v14  ;;  %1101 = vmatprep.mubr.msk.f32.mxu0 %vm1170_vm3, %v1169_v6  ;;  %v852_v14 = vld [vmem:[%s1460_s1 + $0xa0] ss:$0 sm:$0xff] }
 0x56d   :  { %1087 = vmatprep.subr.mxu0 %v1169_v6 }
 0x56e   :  { %1088 = vmatpush3.msra.mxu0 %v1223_v15 }
 0x56f   :  { %1089 = vmatprep.subr.mxu0 %v1169_v6 }
 0x570   :  { %1090 = vmatpush3.msra.mxu0 %v1230_v16 }
 0x571   :  { %1091 = vmatprep.subr.mxu0 %v1169_v6 }
 0x572   :  { %1092 = vmatpush3.msra.mxu0 %v1240_v17 }
 0x573   :  { %1093 = vmatprep.subr.mxu0 %v1169_v6 }
 0x574   :  { %1094 = vmatpush3.msra.mxu0 %v1249_v18 }
 0x575   :  { %1095 = vmatprep.subr.mxu0 %v1169_v6 }
 0x576   :  { %1096 = vmatpush3.msra.mxu0 %v1258_v19 }
 0x577   :  { %1097 = vmatprep.subr.mxu0 %v1169_v6 }
 0x578   :  { %1098 = vmatpush3.msra.mxu0 %v1267_v20 }
 0x579   :  { %1099 = vmatprep.subr.mxu0 %v1169_v6 }
 0x57a   :  { %1100 = vmatpush3.msra.mxu0 %v1276_v21 }
 0x62b   :  { %v588_v51 = vpop.f32.mrf.mxu0 }
 0x62c   :  { %v589_v52 = vadd.f32 %v588_v51, %v517_v50 }
 0x62d   :  { %v1065_v53 = vpop.f32.mrf.mxu0 }
 0x62e   :  { %1140 = vtanh.f32 %v589_v52 }
 0x63b   :  { %v1141_v54 = vpop.eup %1140 }
 0x63c   :  { %1083 = vmatmul.mubr.msk.f32.vlgmr.msra.gmra.mxu1 %vm139_vm5, %v1141_v54 }
 0x63d   :  { %1120 = vmatprep.mubr.msk.f32.mxu1 %vm1170_vm3, %v1169_v6  ;;  %1105 = vmatpush3.msra.mxu1 %v31_v60 }
 0x63e   :  { %1106 = vmatprep.subr.mxu1 %v1169_v6 }
 0x63f   :  { %1107 = vmatpush3.msra.mxu1 %v30_v61 }
 0x640   :  { %1108 = vmatprep.subr.mxu1 %v1169_v6 }
 0x641   :  { %1109 = vmatpush3.msra.mxu1 %v29_v62 }
 0x642   :  { %1110 = vmatprep.subr.mxu1 %v1169_v6 }
 0x643   :  { %1111 = vmatpush3.msra.mxu1 %v28_v63 }
 0x644   :  { %1112 = vmatprep.subr.mxu1 %v1169_v6 }
 0x645   :  { %1113 = vmatpush3.msra.mxu1 %v27_v0 }
 0x646   :  { %1114 = vmatprep.subr.mxu1 %v1169_v6 }
 0x647   :  { %1115 = vmatpush3.msra.mxu1 %v26_v1 }
 0x648   :  { %1116 = vmatprep.subr.mxu1 %v1169_v6 }
 0x649   :  { %1117 = vmatpush3.msra.mxu1 %v25_v2 }
 0x64a   :  { %1118 = vmatprep.subr.mxu1 %v1169_v6 }
 0x64b   :  { %1119 = vmatpush3.msra.mxu1 %v24_v3 }
 0x6fc   :  { %v664_v56 = vpop.f32.mrf.mxu1 }
 0x6fd   :  { %v665_v57 = vadd.f32 %v664_v56, %v593_v55 }
 0x6fe   :  { %v1084_v58 = vpop.f32.mrf.mxu1 }
 0x6ff   :  { %1142 = vtanh.f32 %v665_v57 }
 0x70c   :  { %v1143_v59 = vpop.eup %1142 }
 0x70d   :  { %1102 = vmatmul.mubr.msk.f32.vlgmr.msra.gmra.mxu0 %vm139_vm5, %v1143_v59 }
 0x7cd   :  { %v742_v10 = vpop.f32.mrf.mxu0 }
 0x7ce   :  { %v743_v11 = vadd.f32 %v742_v10, %v672_v9 }
 0x7cf   :  { %v1103_v12 = vpop.f32.mrf.mxu0 }
 0x7d0   :  { %1144 = vtanh.f32 %v743_v11 }
 0x7dd   :  { %v1145_v13 = vpop.eup %1144 }
 0x7de   :  { %1121 = vmatmul.mubr.msk.f32.vlgmr.msra.gmra.mxu1 %vm139_vm5, %v1145_v13 }
 0x89e   :  { %v820_v6 = vpop.f32.mrf.mxu1 }
 0x89f   :  { %v821_v15 = vadd.f32 %v852_v14, %v820_v6 }
 0x8a0   :  { %v1122_v8 = vpop.f32.mrf.mxu1 }
 0x8a1   :  { %825 = vst.msk [vmem:[#allocation2] sm:$0x3] %vm824_vm6, %v821_v15 }
 0x8a2   :  { %1157 = shalt.err (!%p1154_p4)
}
 0x8a3   :  { %835 = dma.vmem_to_hbm [thread:$0]  %s833_s26, 32, %s1461_s2, [#allocation3]  }
 0x8a4   :  { %1166 = dma.done.wait [#allocation3], 32  }
 0x8a5   :  { %1167 = vsyncadd [#allocation3], 4294967264 }
 0x8a6   :  { %839 = vsyncpa [#allocation3], 1 }

</bundles_post_ra>
